<compile_context>
chip_gen: v7x
topology: tpu7x:2x2x1
jax: 0.10.0
libtpu: 0.0.40
codegen_flags: <defaults>
</compile_context>

<pallas_src>
import jax
import jax.numpy as jnp
from jax.experimental import pallas as pl
from jax.experimental.pallas import tpu as pltpu


def _round_up(n, m):
    return ((n + m - 1) // m) * m


def dqn_kernel(x_ref,
               w1_ref, b1_ref,
               w2_ref, b2_ref,
               w3_ref, b3_ref,
               w4_ref, b4_ref,
               w5_ref, b5_ref,
               out_ref):
    """Fused 5-layer MLP forward on one batch tile.

    x_ref:   (tile_b, input_dim) f32   (natural, unpadded feature width)
    w*_ref:  (in_pad, out_pad)   bf16  (pre-transposed, zero-padded to 128 lanes)
    b*_ref:  (1, out_pad)        f32   (broadcasts over the batch tile)
    out_ref: (tile_b, 128)       f32   (lane-dense padded output slab)
    """

    def layer(h, w_ref, b_ref, apply_relu):
        # bf16 operands into the MXU, f32 accumulation, f32 epilogue.
        acc = jnp.dot(h.astype(jnp.bfloat16), w_ref[...],
                      preferred_element_type=jnp.float32)
        acc = acc + b_ref[...]
        if apply_relu:
            acc = jnp.maximum(acc, 0.0)
        return acc

    h = x_ref[...]
    h = layer(h, w1_ref, b1_ref, True)
    h = layer(h, w2_ref, b2_ref, True)
    h = layer(h, w3_ref, b3_ref, True)
    h = layer(h, w4_ref, b4_ref, True)
    h = layer(h, w5_ref, b5_ref, False)
    out_ref[...] = h.astype(out_ref.dtype)


def init_linear_params(key, in_dim, out_dim):
    """Deterministic init mimicking nn.Linear's default (uniform +/- 1/sqrt(in)).

    Weights are stored pre-transposed as (in_dim, out_dim) so the kernel runs
    plain y = x @ W + b on the MXU. Biases are (1, out_dim).
    """
    kw, kb = jax.random.split(key)
    bound = 1.0 / jnp.sqrt(jnp.float32(in_dim))
    w_t = jax.random.uniform(kw, (in_dim, out_dim), jnp.float32, -bound, bound)
    b = jax.random.uniform(kb, (1, out_dim), jnp.float32, -bound, bound)
    return w_t, b


def _plan_batch(B, batch_tile):
    """Pick (tile_b, b_pad, n_tiles) minimizing batch padding.

    - batch_tile is rounded up to a multiple of 8 (f32 sublanes).
    - For non-trivial batches the grid is forced to an even count >= 2 so the
      "parallel" axis can be sharded across v7x's two TensorCores.
    """
    batch_tile = max(8, _round_up(int(batch_tile), 8))
    n_tiles = pl.cdiv(B, batch_tile)
    if B >= 256:
        if n_tiles < 2:
            n_tiles = 2
        elif n_tiles % 2 == 1:
            n_tiles += 1
    tile_b = _round_up(pl.cdiv(B, n_tiles), 8)
    b_pad = n_tiles * tile_b
    return tile_b, b_pad, n_tiles


def deep_q_network_forward(x, params, *, batch_tile=1024):
    """x: (B, input_dim) float32.  params: list of f32 (w_t, b) pairs."""
    B, input_dim = x.shape
    action_space = params[-1][0].shape[1]

    tile_b, b_pad, n_tiles = _plan_batch(B, batch_tile)

    # Batch-only padding of x (feature axis stays at its natural width).
    if b_pad != B:
        x_p = jnp.zeros((b_pad, input_dim), x.dtype).at[:B, :].set(x)
    else:
        x_p = x

    # Zero-pad every layer's output width to a multiple of 128 (lane-dense
    # intermediates) and each layer's input width to the previous layer's
    # padded output width.  Exact: padded biases are zero, so padded
    # activation columns are relu(0) = 0 and padded weight rows multiply
    # zeros.  Layer 0 keeps its natural K = input_dim.
    flat_args = [x_p]
    prev_out_pad = input_dim
    for (w_t, b) in params:
        k_in, n_out = w_t.shape
        n_out_pad = _round_up(n_out, 128)
        w_p = (jnp.zeros((prev_out_pad, n_out_pad), w_t.dtype)
               .at[:k_in, :n_out].set(w_t))
        b_p = (jnp.zeros((1, n_out_pad), b.dtype)
               .at[:, :n_out].set(b))
        flat_args.append(w_p.astype(jnp.bfloat16))   # bf16 weights (MXU)
        flat_args.append(b_p.astype(jnp.float32))    # f32 biases (VPU epilogue)
        prev_out_pad = n_out_pad
    final_out_pad = prev_out_pad

    grid = (n_tiles,)

    # x / out are tiled along the batch; weights & biases use constant
    # index_maps so they stay VMEM-resident across all grid steps.
    in_specs = [pl.BlockSpec((tile_b, input_dim), lambda i: (i, 0))]
    for arg in flat_args[1:]:
        in_specs.append(pl.BlockSpec(arg.shape, lambda i: (0, 0)))
    out_spec = pl.BlockSpec((tile_b, final_out_pad), lambda i: (i, 0))

    out_padded = pl.pallas_call(
        dqn_kernel,
        out_shape=jax.ShapeDtypeStruct((b_pad, final_out_pad), jnp.float32),
        grid=grid,
        in_specs=in_specs,
        out_specs=out_spec,
        compiler_params=pltpu.CompilerParams(
            dimension_semantics=("parallel",)),
    )(*flat_args)

    return out_padded[:B, :action_space]


def reference_forward(x, params):
    """Plain-JAX f32 reference matching the PyTorch module semantics."""
    h = x
    for i, (w_t, b) in enumerate(params):
        h = h @ w_t + b
        if i < len(params) - 1:
            h = jnp.maximum(h, 0.0)
    return h


if __name__ == "__main__":
    # Small, module-consistent shapes: batch=2, input_dim=16, action_space=4.
    batch = 2
    input_dim = 16
    action_space = 4
    layer_dims = [(input_dim, 128), (128, 128), (128, 64), (64, 32),
                  (32, action_space)]

    key = jax.random.PRNGKey(0)
    keys = jax.random.split(key, len(layer_dims) + 1)

    params = [init_linear_params(keys[i], din, dout)
              for i, (din, dout) in enumerate(layer_dims)]
    x = jax.random.normal(keys[-1], (batch, input_dim), jnp.float32)

    out = deep_q_network_forward(x, params)
    out = jax.block_until_ready(out)

    ref = reference_forward(x, params)
    assert out.shape == (batch, action_space), out.shape
    # bf16 weights on the MXU path -> loosened tolerance vs. the f32 reference.
    assert jnp.allclose(out, ref, atol=5e-2, rtol=5e-2), (
        f"max abs diff {jnp.max(jnp.abs(out - ref))}")

    print("KERNEL_OK")
</pallas_src>

<mosaic_0001>
module attributes {stable_mosaic.version = 11 : i64} {
  func.func @dqn_kernel(%arg0: i32, %arg1: memref<8x16xf32, #tpu.memory_space<vmem>>, %arg2: memref<16x128xbf16, #tpu.memory_space<vmem>>, %arg3: memref<1x128xf32, #tpu.memory_space<vmem>>, %arg4: memref<128x128xbf16, #tpu.memory_space<vmem>>, %arg5: memref<1x128xf32, #tpu.memory_space<vmem>>, %arg6: memref<128x128xbf16, #tpu.memory_space<vmem>>, %arg7: memref<1x128xf32, #tpu.memory_space<vmem>>, %arg8: memref<128x128xbf16, #tpu.memory_space<vmem>>, %arg9: memref<1x128xf32, #tpu.memory_space<vmem>>, %arg10: memref<128x128xbf16, #tpu.memory_space<vmem>>, %arg11: memref<1x128xf32, #tpu.memory_space<vmem>>, %arg12: memref<8x128xf32, #tpu.memory_space<vmem>>) attributes {dimension_semantics = [#tpu.dimension_semantics<parallel>], iteration_bounds = array<i64: 1>, scalar_prefetch = 0 : i64, scratch_operands = 0 : i64, tpu.core_type = #tpu.core_type<tc>, window_params = [{transform_indices = @transform_0, window_bounds = array<i64: 8, 16>}, {pipeline_mode = #tpu.pipeline_mode<synchronous>, transform_indices = @transform_1, window_bounds = array<i64: 16, 128>}, {pipeline_mode = #tpu.pipeline_mode<synchronous>, transform_indices = @transform_2, window_bounds = array<i64: 1, 128>}, {pipeline_mode = #tpu.pipeline_mode<synchronous>, transform_indices = @transform_3, window_bounds = array<i64: 128, 128>}, {pipeline_mode = #tpu.pipeline_mode<synchronous>, transform_indices = @transform_4, window_bounds = array<i64: 1, 128>}, {pipeline_mode = #tpu.pipeline_mode<synchronous>, transform_indices = @transform_5, window_bounds = array<i64: 128, 128>}, {pipeline_mode = #tpu.pipeline_mode<synchronous>, transform_indices = @transform_6, window_bounds = array<i64: 1, 128>}, {pipeline_mode = #tpu.pipeline_mode<synchronous>, transform_indices = @transform_7, window_bounds = array<i64: 128, 128>}, {pipeline_mode = #tpu.pipeline_mode<synchronous>, transform_indices = @transform_8, window_bounds = array<i64: 1, 128>}, {pipeline_mode = #tpu.pipeline_mode<synchronous>, transform_indices = @transform_9, window_bounds = array<i64: 128, 128>}, {pipeline_mode = #tpu.pipeline_mode<synchronous>, transform_indices = @transform_10, window_bounds = array<i64: 1, 128>}, {transform_indices = @transform_11, window_bounds = array<i64: 8, 128>}]} {
    %c0 = arith.constant 0 : index
    %c0_0 = arith.constant 0 : index
    %0 = vector.load %arg1[%c0, %c0_0] : memref<8x16xf32, #tpu.memory_space<vmem>>, vector<8x16xf32>
    %1 = arith.truncf %0 : vector<8x16xf32> to vector<8x16xbf16>
    %c0_1 = arith.constant 0 : index
    %c0_2 = arith.constant 0 : index
    %2 = vector.load %arg2[%c0_1, %c0_2] : memref<16x128xbf16, #tpu.memory_space<vmem>>, vector<16x128xbf16>
    %cst = arith.constant dense<0.000000e+00> : vector<8x128xf32>
    %3 = tpu.matmul %1, %2, %cst {dimension_numbers = #tpu.dot_dimension_numbers<[1], [0], [0], [1], [0, 0, 1, 1], [], []>} : vector<8x16xbf16>, vector<16x128xbf16>, vector<8x128xf32> -> vector<8x128xf32>
    %c0_3 = arith.constant 0 : index
    %c0_4 = arith.constant 0 : index
    %4 = vector.load %arg3[%c0_3, %c0_4] : memref<1x128xf32, #tpu.memory_space<vmem>>, vector<1x128xf32>
    %5 = vector.broadcast %4 : vector<1x128xf32> to vector<8x128xf32>
    %6 = arith.addf %3, %5 : vector<8x128xf32>
    %cst_5 = arith.constant 0.000000e+00 : f32
    %7 = vector.broadcast %cst_5 : f32 to vector<8x128xf32>
    %8 = arith.maximumf %6, %7 : vector<8x128xf32>
    %9 = arith.truncf %8 : vector<8x128xf32> to vector<8x128xbf16>
    %c0_6 = arith.constant 0 : index
    %c0_7 = arith.constant 0 : index
    %10 = vector.load %arg4[%c0_6, %c0_7] : memref<128x128xbf16, #tpu.memory_space<vmem>>, vector<128x128xbf16>
    %cst_8 = arith.constant dense<0.000000e+00> : vector<8x128xf32>
    %11 = tpu.matmul %9, %10, %cst_8 {dimension_numbers = #tpu.dot_dimension_numbers<[1], [0], [0], [1], [0, 0, 1, 1], [], []>} : vector<8x128xbf16>, vector<128x128xbf16>, vector<8x128xf32> -> vector<8x128xf32>
    %c0_9 = arith.constant 0 : index
    %c0_10 = arith.constant 0 : index
    %12 = vector.load %arg5[%c0_9, %c0_10] : memref<1x128xf32, #tpu.memory_space<vmem>>, vector<1x128xf32>
    %13 = vector.broadcast %12 : vector<1x128xf32> to vector<8x128xf32>
    %14 = arith.addf %11, %13 : vector<8x128xf32>
    %cst_11 = arith.constant 0.000000e+00 : f32
    %15 = vector.broadcast %cst_11 : f32 to vector<8x128xf32>
    %16 = arith.maximumf %14, %15 : vector<8x128xf32>
    %17 = arith.truncf %16 : vector<8x128xf32> to vector<8x128xbf16>
    %c0_12 = arith.constant 0 : index
    %c0_13 = arith.constant 0 : index
    %18 = vector.load %arg6[%c0_12, %c0_13] : memref<128x128xbf16, #tpu.memory_space<vmem>>, vector<128x128xbf16>
    %cst_14 = arith.constant dense<0.000000e+00> : vector<8x128xf32>
    %19 = tpu.matmul %17, %18, %cst_14 {dimension_numbers = #tpu.dot_dimension_numbers<[1], [0], [0], [1], [0, 0, 1, 1], [], []>} : vector<8x128xbf16>, vector<128x128xbf16>, vector<8x128xf32> -> vector<8x128xf32>
    %c0_15 = arith.constant 0 : index
    %c0_16 = arith.constant 0 : index
    %20 = vector.load %arg7[%c0_15, %c0_16] : memref<1x128xf32, #tpu.memory_space<vmem>>, vector<1x128xf32>
    %21 = vector.broadcast %20 : vector<1x128xf32> to vector<8x128xf32>
    %22 = arith.addf %19, %21 : vector<8x128xf32>
    %cst_17 = arith.constant 0.000000e+00 : f32
    %23 = vector.broadcast %cst_17 : f32 to vector<8x128xf32>
    %24 = arith.maximumf %22, %23 : vector<8x128xf32>
    %25 = arith.truncf %24 : vector<8x128xf32> to vector<8x128xbf16>
    %c0_18 = arith.constant 0 : index
    %c0_19 = arith.constant 0 : index
    %26 = vector.load %arg8[%c0_18, %c0_19] : memref<128x128xbf16, #tpu.memory_space<vmem>>, vector<128x128xbf16>
    %cst_20 = arith.constant dense<0.000000e+00> : vector<8x128xf32>
    %27 = tpu.matmul %25, %26, %cst_20 {dimension_numbers = #tpu.dot_dimension_numbers<[1], [0], [0], [1], [0, 0, 1, 1], [], []>} : vector<8x128xbf16>, vector<128x128xbf16>, vector<8x128xf32> -> vector<8x128xf32>
    %c0_21 = arith.constant 0 : index
    %c0_22 = arith.constant 0 : index
    %28 = vector.load %arg9[%c0_21, %c0_22] : memref<1x128xf32, #tpu.memory_space<vmem>>, vector<1x128xf32>
    %29 = vector.broadcast %28 : vector<1x128xf32> to vector<8x128xf32>
    %30 = arith.addf %27, %29 : vector<8x128xf32>
    %cst_23 = arith.constant 0.000000e+00 : f32
    %31 = vector.broadcast %cst_23 : f32 to vector<8x128xf32>
    %32 = arith.maximumf %30, %31 : vector<8x128xf32>
    %33 = arith.truncf %32 : vector<8x128xf32> to vector<8x128xbf16>
    %c0_24 = arith.constant 0 : index
    %c0_25 = arith.constant 0 : index
    %34 = vector.load %arg10[%c0_24, %c0_25] : memref<128x128xbf16, #tpu.memory_space<vmem>>, vector<128x128xbf16>
    %cst_26 = arith.constant dense<0.000000e+00> : vector<8x128xf32>
    %35 = tpu.matmul %33, %34, %cst_26 {dimension_numbers = #tpu.dot_dimension_numbers<[1], [0], [0], [1], [0, 0, 1, 1], [], []>} : vector<8x128xbf16>, vector<128x128xbf16>, vector<8x128xf32> -> vector<8x128xf32>
    %c0_27 = arith.constant 0 : index
    %c0_28 = arith.constant 0 : index
    %36 = vector.load %arg11[%c0_27, %c0_28] : memref<1x128xf32, #tpu.memory_space<vmem>>, vector<1x128xf32>
    %37 = vector.broadcast %36 : vector<1x128xf32> to vector<8x128xf32>
    %38 = arith.addf %35, %37 : vector<8x128xf32>
    %c0_29 = arith.constant 0 : index
    %c0_30 = arith.constant 0 : index
    %39 = vector.load %arg12[%c0_29, %c0_30] : memref<8x128xf32, #tpu.memory_space<vmem>>, vector<8x128xf32>
    tpu.vector_store %arg12[%c0_29, %c0_30], %38 {strides = array<i32>} : memref<8x128xf32, #tpu.memory_space<vmem>>, vector<8x128xf32>,
    return
  }
  func.func @transform_0(%arg0: i32) -> (i32, i32) {
    %c0_i32 = arith.constant 0 : i32
    %c0_i32_0 = arith.constant 0 : i32
    return %arg0, %c0_i32 : i32, i32
  }
  func.func @transform_1(%arg0: i32) -> (i32, i32) {
    %c0_i32 = arith.constant 0 : i32
    %c0_i32_0 = arith.constant 0 : i32
    %c0_i32_1 = arith.constant 0 : i32
    return %c0_i32, %c0_i32_0 : i32, i32
  }
  func.func @transform_2(%arg0: i32) -> (i32, i32) {
    %c0_i32 = arith.constant 0 : i32
    %c0_i32_0 = arith.constant 0 : i32
    %c0_i32_1 = arith.constant 0 : i32
    return %c0_i32, %c0_i32_0 : i32, i32
  }
  func.func @transform_3(%arg0: i32) -> (i32, i32) {
    %c0_i32 = arith.constant 0 : i32
    %c0_i32_0 = arith.constant 0 : i32
    %c0_i32_1 = arith.constant 0 : i32
    return %c0_i32, %c0_i32_0 : i32, i32
  }
  func.func @transform_4(%arg0: i32) -> (i32, i32) {
    %c0_i32 = arith.constant 0 : i32
    %c0_i32_0 = arith.constant 0 : i32
    %c0_i32_1 = arith.constant 0 : i32
    return %c0_i32, %c0_i32_0 : i32, i32
  }
  func.func @transform_5(%arg0: i32) -> (i32, i32) {
    %c0_i32 = arith.constant 0 : i32
    %c0_i32_0 = arith.constant 0 : i32
    %c0_i32_1 = arith.constant 0 : i32
    return %c0_i32, %c0_i32_0 : i32, i32
  }
  func.func @transform_6(%arg0: i32) -> (i32, i32) {
    %c0_i32 = arith.constant 0 : i32
    %c0_i32_0 = arith.constant 0 : i32
    %c0_i32_1 = arith.constant 0 : i32
    return %c0_i32, %c0_i32_0 : i32, i32
  }
  func.func @transform_7(%arg0: i32) -> (i32, i32) {
    %c0_i32 = arith.constant 0 : i32
    %c0_i32_0 = arith.constant 0 : i32
    %c0_i32_1 = arith.constant 0 : i32
    return %c0_i32, %c0_i32_0 : i32, i32
  }
  func.func @transform_8(%arg0: i32) -> (i32, i32) {
    %c0_i32 = arith.constant 0 : i32
    %c0_i32_0 = arith.constant 0 : i32
    %c0_i32_1 = arith.constant 0 : i32
    return %c0_i32, %c0_i32_0 : i32, i32
  }
  func.func @transform_9(%arg0: i32) -> (i32, i32) {
    %c0_i32 = arith.constant 0 : i32
    %c0_i32_0 = arith.constant 0 : i32
    %c0_i32_1 = arith.constant 0 : i32
    return %c0_i32, %c0_i32_0 : i32, i32
  }
  func.func @transform_10(%arg0: i32) -> (i32, i32) {
    %c0_i32 = arith.constant 0 : i32
    %c0_i32_0 = arith.constant 0 : i32
    %c0_i32_1 = arith.constant 0 : i32
    return %c0_i32, %c0_i32_0 : i32, i32
  }
  func.func @transform_11(%arg0: i32) -> (i32, i32) {
    %c0_i32 = arith.constant 0 : i32
    %c0_i32_0 = arith.constant 0 : i32
    return %arg0, %c0_i32 : i32, i32
  }
}

</mosaic_0001>

<bundles_post_ra>
// kernel: tpu_custom_call.1
= control target key start
LH: loop header
LB: loop body
LE: loop exit
PB: predicated region body
PF: predicated region fallthrough
CT: control target
= control target key end

     0   :  { %16 = vsyncpa [#allocation3], 0  ;;  %s1251_s0 = inlined_call_operand.hbm [shape: f32[8,16], index: 0, kind: input, shape index: {}]   ;;  %s1252_s1 = inlined_call_operand.hbm [shape: bf16[16,128], index: 1, kind: input, shape index: {}]   ;;  %s1253_s2 = inlined_call_operand.vmem [shape: f32[1,128], index: 2, kind: input, shape index: {}]   ;;  %s1254_s3 = inlined_call_operand.hbm [shape: bf16[128,128], index: 3, kind: input, shape index: {}]   ;;  %s1255_s4 = inlined_call_operand.vmem [shape: f32[1,128], index: 4, kind: input, shape index: {}]   ;;  %s1256_s5 = inlined_call_operand.hbm [shape: bf16[128,128], index: 5, kind: input, shape index: {}]   ;;  %s1257_s6 = inlined_call_operand.vmem [shape: f32[1,128], index: 6, kind: input, shape index: {}]   ;;  %s1258_s7 = inlined_call_operand.hbm [shape: bf16[128,128], index: 7, kind: input, shape index: {}]   ;;  %s1259_s8 = inlined_call_operand.vmem [shape: f32[1,128], index: 8, kind: input, shape index: {}]   ;;  %s1260_s9 = inlined_call_operand.hbm [shape: bf16[128,128], index: 9, kind: input, shape index: {}]   ;;  %s1261_s10 = inlined_call_operand.vmem [shape: f32[1,128], index: 10, kind: input, shape index: {}]   ;;  %s1262_s11 = inlined_call_operand.hbm [shape: f32[8,128], index: 11, kind: output, shape index: {}]  }
   0x1   :  { %17 = vsyncpa [#allocation6], 0 }
   0x2   :  { %18 = vsyncpa [#allocation9], 0 }
   0x3   :  { %19 = vsyncpa [#allocation12], 0 }
   0x4   :  { %20 = vsyncpa [#allocation4], 0  ;;  %s1023_s17 = smov [#allocation5]   ;;  %s859_s21 = scalar_lea.hbm %s1252_s1, 128 }
   0x5   :  { %s36_s18 = sshll.u32 %s1023_s17, 4  ;;  %p860_p0 = scmp.ne.s32.totalorder %s1252_s1, %s859_s21  ;;  %s37_s18 = int_to_ptr.vmem [resolvable:$true] %s36_s18 }
   0x6   :  { %p863_p1 = scmp.lt.u32.totalorder %s859_s21, %s1252_s1 }
   0x8   :  { %p865_p2 = pnand %p863_p1, %p860_p0 }
   0xa   :  { %868 = shalt.err (!%p865_p2)
}
   0xb   :  { %s869_s26 = scalar_lea.vmem %s37_s18, 128  ;;  %p874_p4 = scmp.lt.s32.totalorder %s37_s18, %s37_s18 }
   0xc   :  { %p870_p3 = scmp.ne.s32.totalorder %s37_s18, %s869_s26  ;;  %p875_p5 = scmp.lt.s32.totalorder %s869_s26, %s869_s26 }
   0xe   :  { %p876_p6 = por %p875_p5, %p874_p4 }
  0x10   :  { %p877_p7 = pnand %p876_p6, %p870_p3 }
  0x12   :  { %880 = shalt.err (!%p877_p7)
}
  0x13   :  { %s1024_s27 = smov 64   ;;  %s1025_s28 = smov 4  }
  0x14   :  { %42 = dma.hbm_to_vmem [thread:$0]  %s1252_s1, 128, %s37_s18, [#allocation6], %s1024_s27, %s1024_s27, %s1025_s28  }
  0x15   :  { %s1026_s12 = smov [#allocation8]   ;;  %s1027_s14 = smov [#allocation2]  }
  0x16   :  { %s64_s13 = sshll.u32 %s1026_s12, 4  ;;  %s27_s15 = sshll.u32 %s1027_s14, 4  ;;  %s65_s13 = int_to_ptr.vmem [resolvable:$true] %s64_s13  ;;  %s28_s15 = int_to_ptr.vmem [resolvable:$true] %s27_s15 }
  0x17   :  { %s881_s19 = scalar_lea.hbm %s1256_s5, 1024 }
  0x18   :  { %p882_p8 = scmp.ne.s32.totalorder %s1256_s5, %s881_s19  ;;  %p885_p9 = scmp.lt.u32.totalorder %s881_s19, %s1256_s5 }
  0x1a   :  { %p887_p10 = pnand %p885_p9, %p882_p8 }
  0x1c   :  { %890 = shalt.err (!%p887_p10)
}
  0x1d   :  { %s891_s1 = scalar_lea.vmem %s65_s13, 1024  ;;  %p896_p12 = scmp.lt.s32.totalorder %s65_s13, %s65_s13 }
  0x1e   :  { %p892_p11 = scmp.ne.s32.totalorder %s65_s13, %s891_s1  ;;  %p897_p13 = scmp.lt.s32.totalorder %s891_s1, %s891_s1 }
  0x20   :  { %p898_p0 = por %p897_p13, %p896_p12 }
  0x22   :  { %p899_p1 = pnand %p898_p0, %p892_p11 }
  0x24   :  { %902 = shalt.err (!%p899_p1)
}
  0x25   :  { %70 = dma.hbm_to_vmem [thread:$0]  %s1256_s5, 1024, %s65_s13, [#allocation9], %s1024_s27, %s1024_s27, %s1025_s28  }
  0x26   :  { %s903_s29 = scalar_lea.hbm %s1251_s0, 128 }
  0x27   :  { %p904_p2 = scmp.ne.s32.totalorder %s1251_s0, %s903_s29  ;;  %p907_p3 = scmp.lt.u32.totalorder %s903_s29, %s1251_s0 }
  0x29   :  { %p909_p4 = pnand %p907_p3, %p904_p2 }
  0x2b   :  { %912 = shalt.err (!%p909_p4)
}
  0x2c   :  { %s913_s17 = scalar_lea.vmem %s28_s15, 128  ;;  %p918_p6 = scmp.lt.s32.totalorder %s28_s15, %s28_s15 }
  0x2d   :  { %p914_p5 = scmp.ne.s32.totalorder %s28_s15, %s913_s17  ;;  %p919_p7 = scmp.lt.s32.totalorder %s913_s17, %s913_s17 }
  0x2f   :  { %p920_p8 = por %p919_p7, %p918_p6 }
  0x31   :  { %p921_p9 = pnand %p920_p8, %p914_p5 }
  0x33   :  { %924 = shalt.err (!%p921_p9)
}
  0x34   :  { %30 = dma.hbm_to_vmem [thread:$0]  %s1251_s0, 128, %s28_s15, [#allocation3]  }
  0x35   :  { %s1028_s19 = smov [#allocation7]   ;;  %s1029_s21 = smov [#allocation10]  }
  0x36   :  { %s50_s20 = sshll.u32 %s1028_s19, 4  ;;  %s78_s22 = sshll.u32 %s1029_s21, 4  ;;  %s51_s20 = int_to_ptr.vmem [resolvable:$true] %s50_s20  ;;  %s79_s22 = int_to_ptr.vmem [resolvable:$true] %s78_s22 }
  0x37   :  { %s925_s18 = scalar_lea.hbm %s1254_s3, 1024 }
  0x38   :  { %p926_p10 = scmp.ne.s32.totalorder %s1254_s3, %s925_s18  ;;  %p929_p11 = scmp.lt.u32.totalorder %s925_s18, %s1254_s3 }
  0x3a   :  { %p931_p12 = pnand %p929_p11, %p926_p10 }
  0x3c   :  { %934 = shalt.err (!%p931_p12)
}
  0x3d   :  { %s935_s0 = scalar_lea.vmem %s51_s20, 1024  ;;  %p940_p0 = scmp.lt.s32.totalorder %s51_s20, %s51_s20 }
  0x3e   :  { %p936_p13 = scmp.ne.s32.totalorder %s51_s20, %s935_s0  ;;  %p941_p1 = scmp.lt.s32.totalorder %s935_s0, %s935_s0 }
  0x40   :  { %p942_p2 = por %p941_p1, %p940_p0 }
  0x42   :  { %p943_p3 = pnand %p942_p2, %p936_p13 }
  0x44   :  { %946 = shalt.err (!%p943_p3)
}
  0x45   :  { %56 = dma.hbm_to_vmem [thread:$0]  %s1254_s3, 1024, %s51_s20, [#allocation6], %s1024_s27, %s1024_s27, %s1025_s28  }
  0x46   :  { %s947_s16 = scalar_lea.hbm %s1258_s7, 1024 }
  0x47   :  { %p948_p4 = scmp.ne.s32.totalorder %s1258_s7, %s947_s16  ;;  %p951_p5 = scmp.lt.u32.totalorder %s947_s16, %s1258_s7 }
  0x49   :  { %p953_p6 = pnand %p951_p5, %p948_p4 }
  0x4b   :  { %956 = shalt.err (!%p953_p6)
}
  0x4c   :  { %s957_s21 = scalar_lea.vmem %s79_s22, 1024  ;;  %p962_p8 = scmp.lt.s32.totalorder %s79_s22, %s79_s22 }
  0x4d   :  { %p958_p7 = scmp.ne.s32.totalorder %s79_s22, %s957_s21  ;;  %p963_p9 = scmp.lt.s32.totalorder %s957_s21, %s957_s21 }
  0x4f   :  { %p964_p10 = por %p963_p9, %p962_p8 }
  0x51   :  { %p965_p11 = pnand %p964_p10, %p958_p7 }
  0x53   :  { %968 = shalt.err (!%p965_p11)
}
  0x54   :  { %84 = dma.hbm_to_vmem [thread:$0]  %s1258_s7, 1024, %s79_s22, [#allocation9], %s1024_s27, %s1024_s27, %s1025_s28  }
  0x55   :  { %s1030_s23 = smov [#allocation11]   ;;  %s969_s25 = scalar_lea.hbm %s1260_s9, 1024 }
  0x56   :  { %s92_s1 = sshll.u32 %s1030_s23, 4  ;;  %p970_p12 = scmp.ne.s32.totalorder %s1260_s9, %s969_s25  ;;  %s93_s1 = int_to_ptr.vmem [resolvable:$true] %s92_s1 }
  0x57   :  { %p973_p13 = scmp.lt.u32.totalorder %s969_s25, %s1260_s9 }
  0x59   :  { %p975_p0 = pnand %p973_p13, %p970_p12 }
  0x5b   :  { %978 = shalt.err (!%p975_p0)
}
  0x5c   :  { %s979_s30 = scalar_lea.vmem %s93_s1, 1024  ;;  %p984_p2 = scmp.lt.s32.totalorder %s93_s1, %s93_s1 }
  0x5d   :  { %p980_p1 = scmp.ne.s32.totalorder %s93_s1, %s979_s30  ;;  %p985_p3 = scmp.lt.s32.totalorder %s979_s30, %s979_s30 }
  0x5f   :  { %p986_p4 = por %p985_p3, %p984_p2 }
  0x61   :  { %p987_p5 = pnand %p986_p4, %p980_p1 }
  0x63   :  { %990 = shalt.err (!%p987_p5)
}
  0x64   :  { %98 = dma.hbm_to_vmem [thread:$0]  %s1260_s9, 1024, %s93_s1, [#allocation12], %s1024_s27, %s1024_s27, %s1025_s28  }
  0x65   :  { %1013 = dma.done.wait [#allocation3], 128  }
  0x66   :  { %1014 = vsyncadd [#allocation3], 4294967168 }
  0x67   :  { %1015 = dma.done.wait [#allocation6], 1152  }
  0x68   :  { %1016 = vsyncadd [#allocation6], 4294966144 }
  0x69   :  { %1017 = dma.done.wait [#allocation9], 2048  }
  0x6a   :  { %1018 = vsyncadd [#allocation9], 4294965248 }
  0x6b   :  { %1019 = dma.done.wait [#allocation12], 1024  }
  0x6c   :  { %1020 = vsyncadd [#allocation12], 4294966272  ;;  %v1031_v0 = vmov 0.0   ;;  %vm1032_vm0 = vmmov 0   ;;  %v826_v1 = vld [vmem:[#allocation5] sm:$0xff]   ;;  %v120_v2 = vld [vmem:[#allocation2] sm:$0xff] }
  0x6d   :  { %729 = vmatprep.subr.bf16.mxu0 %v1031_v0  ;;  %731 = vmatprep.mubr.msk.bf16.mxu0 %vm1032_vm0, %v1031_v0  ;;  %v121_v3 = vpack.c.bf16 %v120_v2, %v120_v2  ;;  %vm137_vm1 = vcmask 130048   ;;  %v827_v4 = vld [vmem:[#allocation7] sm:$0xff]   ;;  %v828_v5 = vld [vmem:[#allocation7 + $0x8] sm:$0xff]   ;;  %v829_v6 = vld [vmem:[#allocation7 + $0x10] sm:$0xff]   ;;  %s1033_s5 = smov [#allocation13]  }
  0x6e   :  { %735 = vmatprep.subr.bf16.mxu1 %v1031_v0  ;;  %751 = vmatprep.mubr.msk.bf16.mxu1 %vm1032_vm0, %v1031_v0  ;;  %v830_v7 = vld [vmem:[#allocation7 + $0x18] sm:$0xff]   ;;  %v831_v8 = vld [vmem:[#allocation7 + $0x20] sm:$0xff]   ;;  %v832_v9 = vld [vmem:[#allocation7 + $0x28] sm:$0xff]   ;;  %s640_s13 = sshll.u32 %s1033_s5, 4  ;;  %s641_s13 = int_to_ptr.vmem [resolvable:$true] %s640_s13 }
  0x6f   :  { %730 = vmatpush3.bf16.msra.mxu0 %v826_v1  ;;  %736 = vmatpush3.bf16.msra.mxu1 %v827_v4  ;;  %v833_v10 = vld [vmem:[#allocation7 + $0x30] sm:$0xff]   ;;  %v834_v11 = vld [vmem:[#allocation7 + $0x38] sm:$0xff]   ;;  %v835_v12 = vld [vmem:[#allocation8] sm:$0xff]   ;;  %p996_p7 = scmp.lt.s32.totalorder %s641_s13, %s641_s13 }
  0x70   :  { %755 = vmatprep.subr.bf16.mxu0 %v1031_v0  ;;  %737 = vmatprep.subr.bf16.mxu1 %v1031_v0  ;;  %v836_v13 = vld [vmem:[#allocation8 + $0x8] sm:$0xff]   ;;  %v837_v14 = vld [vmem:[#allocation8 + $0x10] sm:$0xff]   ;;  %v838_v15 = vld [vmem:[#allocation8 + $0x18] sm:$0xff]  }
  0x71   :  { %v839_v16 = vld [vmem:[#allocation8 + $0x20] sm:$0xff]   ;;  %v840_v17 = vld [vmem:[#allocation8 + $0x28] sm:$0xff]   ;;  %v652_v18 = vld [vmem:[%s1253_s2] ss:$0 sm:$0xff] }
  0x72   :  { %732 = vmatmul.mubr.msk.bf16.vlgmr.msra.gmra.mrb[0].mxu0 %vm137_vm1, %v121_v3  ;;  %v841_v26 = vld [vmem:[#allocation8 + $0x30] sm:$0xff]   ;;  %v842_v27 = vld [vmem:[#allocation8 + $0x38] sm:$0xff]   ;;  %v843_v28 = vld [vmem:[#allocation10] sm:$0xff]  }
  0x73   :  { %771 = vmatprep.mubr.msk.bf16.mxu0 %vm1032_vm0, %v1031_v0  ;;  %738 = vmatpush3.bf16.msra.mxu1 %v828_v5  ;;  %v844_v29 = vld [vmem:[#allocation10 + $0x8] sm:$0xff]   ;;  %v845_v30 = vld [vmem:[#allocation10 + $0x10] sm:$0xff]   ;;  %v846_v31 = vld [vmem:[#allocation10 + $0x18] sm:$0xff]  }
  0x74   :  { %739 = vmatprep.subr.bf16.mxu1 %v1031_v0  ;;  %756 = vmatpush3.bf16.msra.mxu0 %v835_v12  ;;  %v847_v32 = vld [vmem:[#allocation10 + $0x20] sm:$0xff]   ;;  %v848_v33 = vld [vmem:[#allocation10 + $0x28] sm:$0xff]   ;;  %v655_v34 = vld [vmem:[%s1255_s4] ss:$0 sm:$0xff] }
  0x75   :  { %757 = vmatprep.subr.bf16.mxu0 %v1031_v0  ;;  %v849_v42 = vld [vmem:[#allocation10 + $0x30] sm:$0xff]   ;;  %v850_v43 = vld [vmem:[#allocation10 + $0x38] sm:$0xff]   ;;  %v851_v44 = vld [vmem:[#allocation11] sm:$0xff]  }
  0x76   :  { %v852_v45 = vld [vmem:[#allocation11 + $0x8] sm:$0xff]   ;;  %v853_v46 = vld [vmem:[#allocation11 + $0x10] sm:$0xff]   ;;  %v854_v47 = vld [vmem:[#allocation11 + $0x18] sm:$0xff]  }
  0x77   :  { %740 = vmatpush3.bf16.msra.mxu1 %v829_v6  ;;  %v855_v48 = vld [vmem:[#allocation11 + $0x20] sm:$0xff]   ;;  %v856_v49 = vld [vmem:[#allocation11 + $0x28] sm:$0xff]   ;;  %v664_v50 = vld [vmem:[%s1257_s6] ss:$0 sm:$0xff] }
  0x78   :  { %741 = vmatprep.subr.bf16.mxu1 %v1031_v0  ;;  %758 = vmatpush3.bf16.msra.mxu0 %v836_v13  ;;  %v857_v58 = vld [vmem:[#allocation11 + $0x30] sm:$0xff]   ;;  %v858_v59 = vld [vmem:[#allocation11 + $0x38] sm:$0xff]  }
  0x79   :  { %759 = vmatprep.subr.bf16.mxu0 %v1031_v0  ;;  %v673_v60 = vld [vmem:[%s1259_s8] ss:$0 sm:$0xff]  ;;  %s991_s8 = scalar_lea.vmem %s641_s13, 128 }
  0x7a   :  { %v682_v5 = vld [vmem:[%s1261_s10] ss:$0 sm:$0xff]  ;;  %p992_p6 = scmp.ne.s32.totalorder %s641_s13, %s991_s8  ;;  %p997_p8 = scmp.lt.s32.totalorder %s991_s8, %s991_s8 }
  0x7b   :  { %742 = vmatpush3.bf16.msra.mxu1 %v830_v7 }
  0x7c   :  { %743 = vmatprep.subr.bf16.mxu1 %v1031_v0  ;;  %760 = vmatpush3.bf16.msra.mxu0 %v837_v14  ;;  %p998_p9 = por %p997_p8, %p996_p7 }
  0x7d   :  { %761 = vmatprep.subr.bf16.mxu0 %v1031_v0 }
  0x7e   :  { %p999_p10 = pnand %p998_p9, %p992_p6 }
  0x7f   :  { %744 = vmatpush3.bf16.msra.mxu1 %v831_v8 }
  0x80   :  { %745 = vmatprep.subr.bf16.mxu1 %v1031_v0  ;;  %762 = vmatpush3.bf16.msra.mxu0 %v838_v15 }
  0x81   :  { %763 = vmatprep.subr.bf16.mxu0 %v1031_v0 }
  0x83   :  { %746 = vmatpush3.bf16.msra.mxu1 %v832_v9 }
  0x84   :  { %747 = vmatprep.subr.bf16.mxu1 %v1031_v0  ;;  %764 = vmatpush3.bf16.msra.mxu0 %v839_v16 }
  0x85   :  { %765 = vmatprep.subr.bf16.mxu0 %v1031_v0 }
  0x87   :  { %748 = vmatpush3.bf16.msra.mxu1 %v833_v10 }
  0x88   :  { %749 = vmatprep.subr.bf16.mxu1 %v1031_v0  ;;  %766 = vmatpush3.bf16.msra.mxu0 %v840_v17 }
  0x89   :  { %767 = vmatprep.subr.bf16.mxu0 %v1031_v0 }
  0x8b   :  { %750 = vmatpush3.bf16.msra.mxu1 %v834_v11 }
  0x8c   :  { %775 = vmatprep.subr.bf16.mxu1 %v1031_v0  ;;  %768 = vmatpush3.bf16.msra.mxu0 %v841_v26 }
  0x8d   :  { %769 = vmatprep.subr.bf16.mxu0 %v1031_v0 }
  0x90   :  { %770 = vmatpush3.bf16.msra.mxu0 %v842_v27 }
  0x91   :  { %795 = vmatprep.subr.bf16.mxu0 %v1031_v0 }
 0x145   :  { %v175_v19 = vpop.f32.mrb[0].mxu0 }
 0x146   :  { %v176_v20 = vadd.f32 %v652_v18, %v175_v19  ;;  %v733_v21 = vpop.f32.mrb[1].mxu0 }
 0x147   :  { %v178_v22 = vpop.f32.mrb[2].mxu0 }
 0x148   :  { %v181_v23 = vmax.f32 %v176_v20, 0.0  ;;  %v734_v24 = vpop.f32.mrb[3].mxu0 }
 0x14a   :  { %v182_v25 = vpack.c.bf16 %v181_v23, %v181_v23 }
 0x14c   :  { %752 = vmatmul.mubr.bf16.vlgmr.msra.gmra.mrb[0].mxu1 %v182_v25 }
 0x14d   :  { %791 = vmatprep.mubr.msk.bf16.mxu1 %vm1032_vm0, %v1031_v0  ;;  %776 = vmatpush3.bf16.msra.mxu1 %v843_v28 }
 0x14e   :  { %777 = vmatprep.subr.bf16.mxu1 %v1031_v0 }
 0x151   :  { %778 = vmatpush3.bf16.msra.mxu1 %v844_v29 }
 0x152   :  { %779 = vmatprep.subr.bf16.mxu1 %v1031_v0 }
 0x155   :  { %780 = vmatpush3.bf16.msra.mxu1 %v845_v30 }
 0x156   :  { %781 = vmatprep.subr.bf16.mxu1 %v1031_v0 }
 0x159   :  { %782 = vmatpush3.bf16.msra.mxu1 %v846_v31 }
 0x15a   :  { %783 = vmatprep.subr.bf16.mxu1 %v1031_v0 }
 0x15d   :  { %784 = vmatpush3.bf16.msra.mxu1 %v847_v32 }
 0x15e   :  { %785 = vmatprep.subr.bf16.mxu1 %v1031_v0 }
 0x161   :  { %786 = vmatpush3.bf16.msra.mxu1 %v848_v33 }
 0x162   :  { %787 = vmatprep.subr.bf16.mxu1 %v1031_v0 }
 0x165   :  { %788 = vmatpush3.bf16.msra.mxu1 %v849_v42 }
 0x166   :  { %789 = vmatprep.subr.bf16.mxu1 %v1031_v0 }
 0x169   :  { %790 = vmatpush3.bf16.msra.mxu1 %v850_v43 }
 0x21f   :  { %v288_v35 = vpop.f32.mrb[0].mxu1 }
 0x220   :  { %v289_v36 = vadd.f32 %v655_v34, %v288_v35  ;;  %v753_v37 = vpop.f32.mrb[1].mxu1 }
 0x221   :  { %v291_v38 = vpop.f32.mrb[2].mxu1 }
 0x222   :  { %v294_v39 = vmax.f32 %v289_v36, 0.0  ;;  %v754_v40 = vpop.f32.mrb[3].mxu1 }
 0x224   :  { %v295_v41 = vpack.c.bf16 %v294_v39, %v294_v39 }
 0x226   :  { %772 = vmatmul.mubr.bf16.vlgmr.msra.gmra.mrb[4].mxu0 %v295_v41 }
 0x227   :  { %811 = vmatprep.mubr.msk.bf16.mxu0 %vm1032_vm0, %v1031_v0  ;;  %796 = vmatpush3.bf16.msra.mxu0 %v851_v44 }
 0x228   :  { %797 = vmatprep.subr.bf16.mxu0 %v1031_v0 }
 0x22b   :  { %798 = vmatpush3.bf16.msra.mxu0 %v852_v45 }
 0x22c   :  { %799 = vmatprep.subr.bf16.mxu0 %v1031_v0 }
 0x22f   :  { %800 = vmatpush3.bf16.msra.mxu0 %v853_v46 }
 0x230   :  { %801 = vmatprep.subr.bf16.mxu0 %v1031_v0 }
 0x233   :  { %802 = vmatpush3.bf16.msra.mxu0 %v854_v47 }
 0x234   :  { %803 = vmatprep.subr.bf16.mxu0 %v1031_v0 }
 0x237   :  { %804 = vmatpush3.bf16.msra.mxu0 %v855_v48 }
 0x238   :  { %805 = vmatprep.subr.bf16.mxu0 %v1031_v0 }
 0x23b   :  { %806 = vmatpush3.bf16.msra.mxu0 %v856_v49 }
 0x23c   :  { %807 = vmatprep.subr.bf16.mxu0 %v1031_v0 }
 0x23f   :  { %808 = vmatpush3.bf16.msra.mxu0 %v857_v58 }
 0x240   :  { %809 = vmatprep.subr.bf16.mxu0 %v1031_v0 }
 0x243   :  { %810 = vmatpush3.bf16.msra.mxu0 %v858_v59 }
 0x2f9   :  { %v401_v51 = vpop.f32.mrb[4].mxu0 }
 0x2fa   :  { %v402_v52 = vadd.f32 %v664_v50, %v401_v51  ;;  %v773_v53 = vpop.f32.mrb[5].mxu0 }
 0x2fb   :  { %v404_v54 = vpop.f32.mrb[6].mxu0 }
 0x2fc   :  { %v407_v55 = vmax.f32 %v402_v52, 0.0  ;;  %v774_v56 = vpop.f32.mrb[7].mxu0 }
 0x2fe   :  { %v408_v57 = vpack.c.bf16 %v407_v55, %v407_v55 }
 0x300   :  { %792 = vmatmul.mubr.bf16.vlgmr.msra.gmra.mrb[4].mxu1 %v408_v57 }
 0x3d3   :  { %v514_v61 = vpop.f32.mrb[4].mxu1 }
 0x3d4   :  { %v515_v62 = vadd.f32 %v673_v60, %v514_v61  ;;  %v793_v63 = vpop.f32.mrb[5].mxu1 }
 0x3d5   :  { %v517_v1 = vpop.f32.mrb[6].mxu1 }
 0x3d6   :  { %v520_v2 = vmax.f32 %v515_v62, 0.0  ;;  %v794_v3 = vpop.f32.mrb[7].mxu1 }
 0x3d8   :  { %v521_v4 = vpack.c.bf16 %v520_v2, %v520_v2 }
 0x3da   :  { %812 = vmatmul.mubr.bf16.vlgmr.msra.gmra.mrb[8].mxu0 %v521_v4 }
 0x4ad   :  { %v627_v0 = vpop.f32.mrb[8].mxu0 }
 0x4ae   :  { %v628_v6 = vadd.f32 %v682_v5, %v627_v0  ;;  %v813_v7 = vpop.f32.mrb[9].mxu0 }
 0x4af   :  { %v630_v8 = vpop.f32.mrb[10].mxu0 }
 0x4b0   :  { %633 = vst [vmem:[#allocation13] sm:$0xff] %v628_v6  ;;  %v814_v9 = vpop.f32.mrb[11].mxu0 }
 0x4b1   :  { %1002 = shalt.err (!%p999_p10)
}
 0x4b2   :  { %s1003_s10 = scalar_lea.hbm %s1262_s11, 128 }
 0x4b3   :  { %p1004_p11 = scmp.ne.s32.totalorder %s1262_s11, %s1003_s10  ;;  %p1007_p12 = scmp.lt.u32.totalorder %s1003_s10, %s1262_s11 }
 0x4b5   :  { %p1009_p13 = pnand %p1007_p12, %p1004_p11 }
 0x4b7   :  { %1012 = shalt.err (!%p1009_p13)
}
 0x4b8   :  { %643 = dma.vmem_to_hbm [thread:$0]  %s641_s13, 128, %s1262_s11, [#allocation4]  }
 0x4b9   :  { %1021 = dma.done.wait [#allocation4], 128  }
 0x4ba   :  { %1022 = vsyncadd [#allocation4], 4294967168 }
 0x4bb   :  { %647 = vsyncpa [#allocation3], 1 }
 0x4bc   :  { %648 = vsyncpa [#allocation6], 1 }
 0x4bd   :  { %649 = vsyncpa [#allocation9], 1 }
 0x4be   :  { %650 = vsyncpa [#allocation12], 1 }
 0x4bf   :  { %651 = vsyncpa [#allocation4], 1 }

</bundles_post_ra>
